<compile_context>
chip_gen: v7x
topology: tpu7x:2x2x1
jax: 0.10.0
libtpu: 0.0.40
codegen_flags: <defaults>
</compile_context>

<pallas_src>
import functools

import jax
import jax.numpy as jnp
from jax.experimental import pallas as pl
from jax.experimental.pallas import tpu as pltpu


_VMEM_LIMIT = 64 * 1024 * 1024  # raised scoped-VMEM allowance (<= physical on all gens)


def _choose_tile(dim, target, align):
    """Largest tile <= target that divides `dim` and is a multiple of `align`.

    Falls back to the full dimension (always legal: block == full array dim)."""
    if dim <= target:
        return dim
    t = (target // align) * align
    while t >= align:
        if dim % t == 0:
            return t
        t -= align
    return dim


# ---------------------------------------------------------------------------
# Pallas kernels
# ---------------------------------------------------------------------------
def _head_proj_kernel(x_ref, w_ref, o_ref, acc_ref):
    """Tiled projection with head-split output.

    x_ref:   (1, tm, tk)       activation tile
    w_ref:   (H, tk, C)        per-head weight slabs
    o_ref:   (1, H, tm, C)     head-split output tile
    acc_ref: (H, tm, C) f32    accumulator over the K grid axis
    """
    kk = pl.program_id(2)

    @pl.when(kk == 0)
    def _():
        acc_ref[...] = jnp.zeros_like(acc_ref)

    x = x_ref[0]                          # (tm, tk), native dtype (bf16 ok)
    n_heads = acc_ref.shape[0]
    for h in range(n_heads):              # static unroll over heads
        acc_ref[h] += jnp.dot(x, w_ref[h], preferred_element_type=jnp.float32)

    @pl.when(kk == pl.num_programs(2) - 1)
    def _():
        o_ref[0] = acc_ref[...].astype(o_ref.dtype)


def _attention_kernel(q_ref, k_ref, v_ref, o_ref, *, scale):
    """One (batch, head, q-tile) step.  K/V fully resident for the head.

    q_ref: (1, 1, tq, C), k_ref/v_ref: (1, 1, M, C), o_ref: (1, 1, tq, C)
    """
    q = q_ref[0, 0] * scale               # fold scale into the small q tile
    k = k_ref[0, 0]
    v = v_ref[0, 0]

    # (tq, C) x (M, C) contracted on the last dim -> (tq, M); no explicit k.T.
    s = jax.lax.dot_general(
        q, k, (((1,), (1,)), ((), ())), preferred_element_type=jnp.float32)

    m = jnp.max(s, axis=-1, keepdims=True)          # f32 softmax statistics
    p = jnp.exp(s - m)
    l = jnp.sum(p, axis=-1, keepdims=True)
    attn = p * pl.reciprocal(l, approx=True)        # EUP reciprocal, no divide

    out = jnp.dot(attn.astype(v.dtype), v, preferred_element_type=jnp.float32)
    o_ref[0, 0] = out.astype(o_ref.dtype)


def _out_proj_kernel(a_ref, w_ref, b_ref, o_ref):
    """Output projection consuming head-split attention output directly.

    a_ref: (1, H, tm, C), w_ref: (H, C, tn), b_ref: (1, tn), o_ref: (1, tm, tn)
    """
    n_heads = a_ref.shape[1]
    acc = jnp.zeros(o_ref.shape[1:], jnp.float32)
    for h in range(n_heads):              # static unroll: contraction over heads
        acc = acc + jnp.dot(a_ref[0, h], w_ref[h],
                            preferred_element_type=jnp.float32)
    o_ref[0] = (acc + b_ref[...].astype(jnp.float32)).astype(o_ref.dtype)


# ---------------------------------------------------------------------------
# Pallas wrappers
# ---------------------------------------------------------------------------
def pallas_head_projection(x, w_h, *, tm_target=256, tk_target=512):
    """x: (B, S, Din); w_h: (H, Din, C).  Returns (B, H, S, C)."""
    B, S, Din = x.shape
    H, Din2, C = w_h.shape
    assert Din == Din2
    tm = _choose_tile(S, tm_target, 8)
    tk = _choose_tile(Din, tk_target, 128)
    grid = (B, S // tm, Din // tk)
    return pl.pallas_call(
        _head_proj_kernel,
        out_shape=jax.ShapeDtypeStruct((B, H, S, C), x.dtype),
        grid_spec=pltpu.PrefetchScalarGridSpec(
            num_scalar_prefetch=0,
            grid=grid,
            in_specs=[
                pl.BlockSpec((1, tm, tk), lambda b, i, k: (b, i, k)),
                pl.BlockSpec((H, tk, C), lambda b, i, k: (0, k, 0)),
            ],
            out_specs=pl.BlockSpec((1, H, tm, C), lambda b, i, k: (b, 0, i, 0)),
            scratch_shapes=[pltpu.VMEM((H, tm, C), jnp.float32)],
        ),
        compiler_params=pltpu.CompilerParams(
            dimension_semantics=("parallel", "parallel", "arbitrary"),
            vmem_limit_bytes=_VMEM_LIMIT,
        ),
    )(x, w_h)


def pallas_attention(q_h, k_h, v_h, scale, *, tq_target=256):
    """q_h: (B, H, N, C); k_h/v_h: (B, H, M, C).  Returns (B, H, N, C)."""
    B, H, N, C = q_h.shape
    _, _, M, _ = k_h.shape
    tq = _choose_tile(N, tq_target, 8)
    grid = (B, H, N // tq)
    kern = functools.partial(_attention_kernel, scale=scale)
    return pl.pallas_call(
        kern,
        out_shape=jax.ShapeDtypeStruct((B, H, N, C), q_h.dtype),
        grid_spec=pltpu.PrefetchScalarGridSpec(
            num_scalar_prefetch=0,
            grid=grid,
            in_specs=[
                pl.BlockSpec((1, 1, tq, C), lambda b, h, qi: (b, h, qi, 0)),
                # K/V index_maps ignore qi -> kept resident across q tiles.
                pl.BlockSpec((1, 1, M, C), lambda b, h, qi: (b, h, 0, 0)),
                pl.BlockSpec((1, 1, M, C), lambda b, h, qi: (b, h, 0, 0)),
            ],
            out_specs=pl.BlockSpec((1, 1, tq, C), lambda b, h, qi: (b, h, qi, 0)),
        ),
        compiler_params=pltpu.CompilerParams(
            dimension_semantics=("parallel", "parallel", "parallel"),
            vmem_limit_bytes=_VMEM_LIMIT,
        ),
    )(q_h, k_h, v_h)


def pallas_output_projection(a_h, w_o_h, b_o, *, tm_target=256, tn_target=512):
    """a_h: (B, H, N, C); w_o_h: (H, C, Dq); b_o: (Dq,).  Returns (B, N, Dq)."""
    B, H, N, C = a_h.shape
    H2, C2, Dq = w_o_h.shape
    assert H == H2 and C == C2
    tm = _choose_tile(N, tm_target, 8)
    tn = _choose_tile(Dq, tn_target, 128)
    grid = (B, N // tm, Dq // tn)
    b2d = b_o.reshape(1, Dq)
    return pl.pallas_call(
        _out_proj_kernel,
        out_shape=jax.ShapeDtypeStruct((B, N, Dq), a_h.dtype),
        grid_spec=pltpu.PrefetchScalarGridSpec(
            num_scalar_prefetch=0,
            grid=grid,
            in_specs=[
                pl.BlockSpec((1, H, tm, C), lambda b, i, j: (b, 0, i, 0)),
                pl.BlockSpec((H, C, tn), lambda b, i, j: (0, 0, j)),
                pl.BlockSpec((1, tn), lambda b, i, j: (0, j)),
            ],
            out_specs=pl.BlockSpec((1, tm, tn), lambda b, i, j: (b, i, j)),
        ),
        compiler_params=pltpu.CompilerParams(
            dimension_semantics=("parallel", "parallel", "parallel"),
            vmem_limit_bytes=_VMEM_LIMIT,
        ),
    )(a_h, w_o_h, b2d)


# ---------------------------------------------------------------------------
# CrossAttention module (forward only)
# ---------------------------------------------------------------------------
class CrossAttentionPallas:
    def __init__(self, query_dim, key_dim, value_dim, heads=8, dim_head=64,
                 dropout=0.0, key=None):
        inner_dim = dim_head * heads
        self.scale = dim_head ** (-0.5)
        self.heads = heads
        self.dim_head = dim_head
        self.inner_dim = inner_dim
        self.query_dim = query_dim

        # Deterministic parameter init (PyTorch-like uniform(-1/sqrt(fan_in), +)).
        if key is None:
            key = jax.random.PRNGKey(0)
        k1, k2, k3, k4, k5 = jax.random.split(key, 5)

        def init_w(k, fan_in, fan_out):
            bound = 1.0 / (fan_in ** 0.5)
            return jax.random.uniform(
                k, (fan_in, fan_out), jnp.float32, -bound, bound)

        # Canonical (in, out) weights; kept for the pure-jnp reference.
        self.w_q = init_w(k1, query_dim, inner_dim)      # to_q (no bias)
        self.w_k = init_w(k2, key_dim, inner_dim)        # to_k (no bias)
        self.w_v = init_w(k3, value_dim, inner_dim)      # to_v (no bias)
        self.w_o = init_w(k4, inner_dim, query_dim)      # to_out[0] weight
        bound_o = 1.0 / (inner_dim ** 0.5)
        self.b_o = jax.random.uniform(
            k5, (query_dim,), jnp.float32, -bound_o, bound_o)  # to_out[0] bias

        # Head-split weight layouts used by the kernels (one-time reshape):
        #   (Din, H*C) -> (H, Din, C);  (H*C, Dq) -> (H, C, Dq)
        H, C = heads, dim_head
        self.w_q_h = self.w_q.reshape(query_dim, H, C).transpose(1, 0, 2)
        self.w_k_h = self.w_k.reshape(key_dim, H, C).transpose(1, 0, 2)
        self.w_v_h = self.w_v.reshape(value_dim, H, C).transpose(1, 0, 2)
        self.w_o_h = self.w_o.reshape(H, C, query_dim)

    def __call__(self, x, key, value, mask=None):
        # mask handling of the original module (fill_inf_from_mask) is only used
        # when an attn_bias is provided; this implementation covers mask=None.
        assert mask is None  # TODO(synk): boolean key-padding mask not implemented.
        B, N, _ = x.shape
        _, M, _ = key.shape

        # Projections directly into head-split layout (no XLA transposes).
        q_h = pallas_head_projection(x, self.w_q_h)        # (B, H, N, C)
        k_h = pallas_head_projection(key, self.w_k_h)      # (B, H, M, C)
        v_h = pallas_head_projection(value, self.w_v_h)    # (B, H, M, C)

        # Scaled dot-product attention, query-tiled, K/V resident per head.
        attn = pallas_attention(q_h, k_h, v_h, self.scale)  # (B, H, N, C)

        # Output projection (contracts heads x dim_head, adds bias).
        out = pallas_output_projection(attn, self.w_o_h, self.b_o)
        return out                                           # (B, N, query_dim)


# ---------------------------------------------------------------------------
# Reference (pure jnp) for sanity checking
# ---------------------------------------------------------------------------
def reference_forward(mod, x, key, value):
    B, N, _ = x.shape
    _, M, _ = key.shape
    H, C = mod.heads, mod.dim_head
    q = (x @ mod.w_q).reshape(B, N, H, C).transpose(0, 2, 1, 3).reshape(B * H, N, C)
    k = (key @ mod.w_k).reshape(B, M, H, C).transpose(0, 2, 1, 3).reshape(B * H, M, C)
    v = (value @ mod.w_v).reshape(B, M, H, C).transpose(0, 2, 1, 3).reshape(B * H, M, C)
    s = jnp.einsum("bnc,bmc->bnm", q, k) * mod.scale
    p = jax.nn.softmax(s, axis=-1)
    o = jnp.einsum("bnm,bmc->bnc", p, v)
    o = o.reshape(B, H, N, C).transpose(0, 2, 1, 3).reshape(B, N, H * C)
    return o @ mod.w_o + mod.b_o


# ---------------------------------------------------------------------------
if __name__ == "__main__":
    # Small shapes consistent with the module.
    B, N, M = 2, 16, 8
    query_dim, key_dim, value_dim = 32, 24, 24
    heads, dim_head = 4, 16

    root = jax.random.PRNGKey(0)
    kx, kk, kv, kp = jax.random.split(root, 4)
    x = jax.random.normal(kx, (B, N, query_dim), jnp.float32)
    key_in = jax.random.normal(kk, (B, M, key_dim), jnp.float32)
    value_in = jax.random.normal(kv, (B, M, value_dim), jnp.float32)

    mod = CrossAttentionPallas(query_dim, key_dim, value_dim,
                               heads=heads, dim_head=dim_head, key=kp)

    out = mod(x, key_in, value_in)
    out = jax.block_until_ready(out)

    ref = reference_forward(mod, x, key_in, value_in)
    assert out.shape == (B, N, query_dim)
    # Tolerance loosened slightly vs exact f32: approx (EUP) reciprocal in the
    # softmax normalization has ~2^-12 relative error.
    assert jnp.allclose(out, ref, atol=5e-3, rtol=5e-3), "mismatch vs reference"

    print("KERNEL_OK")
</pallas_src>

<mosaic_0001>
module attributes {stable_mosaic.version = 11 : i64} {
  func.func @_head_proj_kernel(%arg0: i32, %arg1: i32, %arg2: i32, %arg3: memref<1x16x32xf32, #tpu.memory_space<vmem>>, %arg4: memref<4x32x16xf32, #tpu.memory_space<vmem>>, %arg5: memref<1x4x16x16xf32, #tpu.memory_space<vmem>>, %arg6: memref<4x16x16xf32, #tpu.memory_space<vmem>>) attributes {dimension_semantics = [#tpu.dimension_semantics<parallel>, #tpu.dimension_semantics<parallel>, #tpu.dimension_semantics<arbitrary>], iteration_bounds = array<i64: 2, 1, 1>, scalar_prefetch = 0 : i64, scratch_operands = 1 : i64, tpu.core_type = #tpu.core_type<tc>, window_params = [{transform_indices = @transform_0, window_bounds = array<i64: 1, 16, 32>}, {transform_indices = @transform_1, window_bounds = array<i64: 4, 32, 16>}, {transform_indices = @transform_2, window_bounds = array<i64: 1, 4, 16, 16>}]} {
    %c0_i32 = arith.constant 0 : i32
    %0 = arith.cmpi eq, %arg2, %c0_i32 : i32
    %1 = arith.extui %0 : i1 to i32
    %c0_i32_0 = arith.constant 0 : i32
    %2 = arith.cmpi ne, %1, %c0_i32_0 : i32
    scf.if %2 {
      %cst_41 = arith.constant 0.000000e+00 : f32
      %44 = vector.broadcast %cst_41 : f32 to vector<4x16x16xf32>
      %c0_42 = arith.constant 0 : index
      %c0_43 = arith.constant 0 : index
      %c0_44 = arith.constant 0 : index
      %45 = vector.load %arg6[%c0_42, %c0_43, %c0_44] : memref<4x16x16xf32, #tpu.memory_space<vmem>>, vector<4x16x16xf32>
      tpu.vector_store %arg6[%c0_42, %c0_43, %c0_44], %44 {strides = array<i32>} : memref<4x16x16xf32, #tpu.memory_space<vmem>>, vector<4x16x16xf32>,
    } else {
    }
    %c0 = arith.constant 0 : index
    %c0_1 = arith.constant 0 : index
    %c0_2 = arith.constant 0 : index
    %3 = vector.load %arg3[%c0, %c0_1, %c0_2] : memref<1x16x32xf32, #tpu.memory_space<vmem>>, vector<1x16x32xf32>
    %4 = vector.shape_cast %3 : vector<1x16x32xf32> to vector<16x32xf32>
    %c0_3 = arith.constant 0 : index
    %c0_4 = arith.constant 0 : index
    %c0_5 = arith.constant 0 : index
    %5 = vector.load %arg6[%c0_3, %c0_4, %c0_5] : memref<4x16x16xf32, #tpu.memory_space<vmem>>, vector<1x16x16xf32>
    %6 = vector.shape_cast %5 : vector<1x16x16xf32> to vector<16x16xf32>
    %c0_6 = arith.constant 0 : index
    %c0_7 = arith.constant 0 : index
    %c0_8 = arith.constant 0 : index
    %7 = vector.load %arg4[%c0_6, %c0_7, %c0_8] : memref<4x32x16xf32, #tpu.memory_space<vmem>>, vector<1x32x16xf32>
    %8 = vector.shape_cast %7 : vector<1x32x16xf32> to vector<32x16xf32>
    %cst = arith.constant dense<0.000000e+00> : vector<16x16xf32>
    %9 = tpu.matmul %4, %8, %cst {dimension_numbers = #tpu.dot_dimension_numbers<[1], [0], [0], [1], [0, 0, 1, 1], [], []>} : vector<16x32xf32>, vector<32x16xf32>, vector<16x16xf32> -> vector<16x16xf32>
    %10 = arith.addf %6, %9 : vector<16x16xf32>
    %c0_9 = arith.constant 0 : index
    %c0_10 = arith.constant 0 : index
    %c0_11 = arith.constant 0 : index
    %11 = vector.load %arg6[%c0_9, %c0_10, %c0_11] : memref<4x16x16xf32, #tpu.memory_space<vmem>>, vector<1x16x16xf32>
    %12 = vector.shape_cast %11 : vector<1x16x16xf32> to vector<16x16xf32>
    %13 = vector.shape_cast %10 : vector<16x16xf32> to vector<1x16x16xf32>
    tpu.vector_store %arg6[%c0_9, %c0_10, %c0_11], %13 {strides = array<i32>} : memref<4x16x16xf32, #tpu.memory_space<vmem>>, vector<1x16x16xf32>,
    %c1 = arith.constant 1 : index
    %c0_12 = arith.constant 0 : index
    %c0_13 = arith.constant 0 : index
    %14 = vector.load %arg6[%c1, %c0_12, %c0_13] : memref<4x16x16xf32, #tpu.memory_space<vmem>>, vector<1x16x16xf32>
    %15 = vector.shape_cast %14 : vector<1x16x16xf32> to vector<16x16xf32>
    %c1_14 = arith.constant 1 : index
    %c0_15 = arith.constant 0 : index
    %c0_16 = arith.constant 0 : index
    %16 = vector.load %arg4[%c1_14, %c0_15, %c0_16] : memref<4x32x16xf32, #tpu.memory_space<vmem>>, vector<1x32x16xf32>
    %17 = vector.shape_cast %16 : vector<1x32x16xf32> to vector<32x16xf32>
    %cst_17 = arith.constant dense<0.000000e+00> : vector<16x16xf32>
    %18 = tpu.matmul %4, %17, %cst_17 {dimension_numbers = #tpu.dot_dimension_numbers<[1], [0], [0], [1], [0, 0, 1, 1], [], []>} : vector<16x32xf32>, vector<32x16xf32>, vector<16x16xf32> -> vector<16x16xf32>
    %19 = arith.addf %15, %18 : vector<16x16xf32>
    %c1_18 = arith.constant 1 : index
    %c0_19 = arith.constant 0 : index
    %c0_20 = arith.constant 0 : index
    %20 = vector.load %arg6[%c1_18, %c0_19, %c0_20] : memref<4x16x16xf32, #tpu.memory_space<vmem>>, vector<1x16x16xf32>
    %21 = vector.shape_cast %20 : vector<1x16x16xf32> to vector<16x16xf32>
    %22 = vector.shape_cast %19 : vector<16x16xf32> to vector<1x16x16xf32>
    tpu.vector_store %arg6[%c1_18, %c0_19, %c0_20], %22 {strides = array<i32>} : memref<4x16x16xf32, #tpu.memory_space<vmem>>, vector<1x16x16xf32>,
    %c2 = arith.constant 2 : index
    %c0_21 = arith.constant 0 : index
    %c0_22 = arith.constant 0 : index
    %23 = vector.load %arg6[%c2, %c0_21, %c0_22] : memref<4x16x16xf32, #tpu.memory_space<vmem>>, vector<1x16x16xf32>
    %24 = vector.shape_cast %23 : vector<1x16x16xf32> to vector<16x16xf32>
    %c2_23 = arith.constant 2 : index
    %c0_24 = arith.constant 0 : index
    %c0_25 = arith.constant 0 : index
    %25 = vector.load %arg4[%c2_23, %c0_24, %c0_25] : memref<4x32x16xf32, #tpu.memory_space<vmem>>, vector<1x32x16xf32>
    %26 = vector.shape_cast %25 : vector<1x32x16xf32> to vector<32x16xf32>
    %cst_26 = arith.constant dense<0.000000e+00> : vector<16x16xf32>
    %27 = tpu.matmul %4, %26, %cst_26 {dimension_numbers = #tpu.dot_dimension_numbers<[1], [0], [0], [1], [0, 0, 1, 1], [], []>} : vector<16x32xf32>, vector<32x16xf32>, vector<16x16xf32> -> vector<16x16xf32>
    %28 = arith.addf %24, %27 : vector<16x16xf32>
    %c2_27 = arith.constant 2 : index
    %c0_28 = arith.constant 0 : index
    %c0_29 = arith.constant 0 : index
    %29 = vector.load %arg6[%c2_27, %c0_28, %c0_29] : memref<4x16x16xf32, #tpu.memory_space<vmem>>, vector<1x16x16xf32>
    %30 = vector.shape_cast %29 : vector<1x16x16xf32> to vector<16x16xf32>
    %31 = vector.shape_cast %28 : vector<16x16xf32> to vector<1x16x16xf32>
    tpu.vector_store %arg6[%c2_27, %c0_28, %c0_29], %31 {strides = array<i32>} : memref<4x16x16xf32, #tpu.memory_space<vmem>>, vector<1x16x16xf32>,
    %c3 = arith.constant 3 : index
    %c0_30 = arith.constant 0 : index
    %c0_31 = arith.constant 0 : index
    %32 = vector.load %arg6[%c3, %c0_30, %c0_31] : memref<4x16x16xf32, #tpu.memory_space<vmem>>, vector<1x16x16xf32>
    %33 = vector.shape_cast %32 : vector<1x16x16xf32> to vector<16x16xf32>
    %c3_32 = arith.constant 3 : index
    %c0_33 = arith.constant 0 : index
    %c0_34 = arith.constant 0 : index
    %34 = vector.load %arg4[%c3_32, %c0_33, %c0_34] : memref<4x32x16xf32, #tpu.memory_space<vmem>>, vector<1x32x16xf32>
    %35 = vector.shape_cast %34 : vector<1x32x16xf32> to vector<32x16xf32>
    %cst_35 = arith.constant dense<0.000000e+00> : vector<16x16xf32>
    %36 = tpu.matmul %4, %35, %cst_35 {dimension_numbers = #tpu.dot_dimension_numbers<[1], [0], [0], [1], [0, 0, 1, 1], [], []>} : vector<16x32xf32>, vector<32x16xf32>, vector<16x16xf32> -> vector<16x16xf32>
    %37 = arith.addf %33, %36 : vector<16x16xf32>
    %c3_36 = arith.constant 3 : index
    %c0_37 = arith.constant 0 : index
    %c0_38 = arith.constant 0 : index
    %38 = vector.load %arg6[%c3_36, %c0_37, %c0_38] : memref<4x16x16xf32, #tpu.memory_space<vmem>>, vector<1x16x16xf32>
    %39 = vector.shape_cast %38 : vector<1x16x16xf32> to vector<16x16xf32>
    %40 = vector.shape_cast %37 : vector<16x16xf32> to vector<1x16x16xf32>
    tpu.vector_store %arg6[%c3_36, %c0_37, %c0_38], %40 {strides = array<i32>} : memref<4x16x16xf32, #tpu.memory_space<vmem>>, vector<1x16x16xf32>,
    %c0_i32_39 = arith.constant 0 : i32
    %41 = arith.cmpi eq, %arg2, %c0_i32_39 : i32
    %42 = arith.extui %41 : i1 to i32
    %c0_i32_40 = arith.constant 0 : i32
    %43 = arith.cmpi ne, %42, %c0_i32_40 : i32
    scf.if %43 {
      %c0_41 = arith.constant 0 : index
      %c0_42 = arith.constant 0 : index
      %c0_43 = arith.constant 0 : index
      %44 = vector.load %arg6[%c0_41, %c0_42, %c0_43] : memref<4x16x16xf32, #tpu.memory_space<vmem>>, vector<4x16x16xf32>
      %c0_44 = arith.constant 0 : index
      %c0_45 = arith.constant 0 : index
      %c0_46 = arith.constant 0 : index
      %c0_47 = arith.constant 0 : index
      %45 = vector.load %arg5[%c0_44, %c0_45, %c0_46, %c0_47] : memref<1x4x16x16xf32, #tpu.memory_space<vmem>>, vector<1x4x16x16xf32>
      %46 = vector.shape_cast %45 : vector<1x4x16x16xf32> to vector<4x16x16xf32>
      %47 = vector.shape_cast %44 : vector<4x16x16xf32> to vector<1x4x16x16xf32>
      tpu.vector_store %arg5[%c0_44, %c0_45, %c0_46, %c0_47], %47 {strides = array<i32>} : memref<1x4x16x16xf32, #tpu.memory_space<vmem>>, vector<1x4x16x16xf32>,
    } else {
    }
    return
  }
  func.func @transform_0(%arg0: i32, %arg1: i32, %arg2: i32) -> (i32, i32, i32) {
    %c0_i32 = arith.constant 0 : i32
    return %arg0, %arg1, %arg2 : i32, i32, i32
  }
  func.func @transform_1(%arg0: i32, %arg1: i32, %arg2: i32) -> (i32, i32, i32) {
    %c0_i32 = arith.constant 0 : i32
    %c0_i32_0 = arith.constant 0 : i32
    %c0_i32_1 = arith.constant 0 : i32
    return %c0_i32, %arg2, %c0_i32_0 : i32, i32, i32
  }
  func.func @transform_2(%arg0: i32, %arg1: i32, %arg2: i32) -> (i32, i32, i32, i32) {
    %c0_i32 = arith.constant 0 : i32
    %c0_i32_0 = arith.constant 0 : i32
    %c0_i32_1 = arith.constant 0 : i32
    return %arg0, %c0_i32, %arg1, %c0_i32_0 : i32, i32, i32, i32
  }
}

</mosaic_0001>

<bundles_post_ra>
// kernel: tpu_custom_call.1
= control target key start
LH: loop header
LB: loop body
LE: loop exit
PB: predicated region body
PF: predicated region fallthrough
CT: control target
= control target key end

     0   :  { %7 = vsyncpa [#allocation4], 0  ;;  %s1359_s0 = inlined_call_operand.hbm [shape: f32[2,16,32], index: 0, kind: input, shape index: {}]   ;;  %s1360_s1 = inlined_call_operand.hbm [shape: f32[4,32,16], index: 1, kind: input, shape index: {}]   ;;  %s1361_s2 = inlined_call_operand.hbm [shape: f32[2,4,16,16], index: 2, kind: output, shape index: {}]  }
   0x1   :  { %9 = vsyncpa [#allocation4 + $0x1], 0 }
   0x2   :  { %10 = vsyncpa [#allocation7], 0 }
   0x3   :  { %11 = vsyncpa [#allocation5], 0 }
   0x4   :  { %13 = vsyncpa [#allocation5 + $0x1], 0  ;;  %s1097_s9 = smov 0   ;;  %s1099_s10 = smov 0  }
   0x5   :  { %s1101_s11 = smov 0   ;;  %s1103_s12 = smov 0  }
   0x6   :  { %s1105_s13 = smov 0   ;;  %s1107_s14 = smov 0  }
   0x7 LB: > { %s723_s15 = sadd.s32 4294967295, %s1072_s14   ;;  %s724_s16 = sadd.s32 4294967294, %s1072_s14   ;;  %s1072_s14 = sphi %s1107_s14, %s19_s14   ;;  %s1068_s13 = sphi %s1105_s13, %s1385_s13   ;;  %s1064_s12 = sphi %s1103_s12, %s1384_s12   ;;  %s1060_s11 = sphi %s1101_s11, %s1383_s11   ;;  %s1056_s10 = sphi %s1099_s10, %s1382_s10   ;;  %s1052_s9 = sphi %s1097_s9, %s1381_s9  }
   0x8   : > { %p62_p0 = scmp.ne.s32.totalorder %s1056_s10, %s1052_s9  ;;  %p1131_p1 = scmp.eq.s32.totalorder %s723_s15, 0 }
   0x9   : > { %p1135_p2 = scmp.eq.s32.totalorder %s723_s15, 1  ;;  %p120_p3 = scmp.eq.s32.totalorder %s724_s16, 1 }
   0xa   : > { %s1366_s17 = scalar_select %p1131_p1, 1, 0 }
   0xb   : > { %s1367_s18 = scalar_select %p1135_p2, 1, 0 }
   0xc   : > { %p1141_p4 = por %p1131_p1, %p62_p0  ;;  %p725_p5 = scmp.ge.s32.totalorder %s1072_s14, 1 }
   0xd   : > { %p1146_p6 = por %p120_p3, %p62_p0  ;;  %p127_p7 = scmp.lt.s32.totalorder %s1072_s14, 3 }
   0xe   : > { %s1368_s19 = scalar_select %p1141_p4, 1, 0 }
   0xf   : > { %s1369_s20 = scalar_select %p1146_p6, 1, 0 }
  0x10   : > { %p1151_p8 = pnand %p725_p5, %p127_p7  ;;  %s1074_s22 = smov [#allocation6]  }
  0x11   : > { %s142_s23 = sshll.u32 %s1074_s22, 4  ;;  %s38_s25 = sadd.s32 1, %s1068_s13  ;;  %s143_s23 = int_to_ptr.vmem [resolvable:$true] %s142_s23 }
  0x12   : > { %s1370_s21 = scalar_select %p1151_p8, 1, 0 }
  0x13   : > { %p858_p9 = pneg %p1151_p8  ;;  %s928_s28 = scalar_lea.hbm %s1360_s1, 2048 }
  0x14   : > { %p929_p12 = scmp.ne.s32.totalorder %s1360_s1, %s928_s28  ;;  %p935_p5 = scmp.lt.u32.totalorder %s928_s28, %s1360_s1 }
  0x15   : > { %p1160_p11 = pnand %p858_p9, %p1131_p1 }
  0x17   : > { %p930_p13 = pneg %p1160_p11 }
  0x19   : > { %p931_p0 = pnand %p930_p13, %p929_p12 }
  0x1b   : > { %p932_p3 = pneg %p931_p0 }
  0x1d   : > { %p937_p7 = pnand %p935_p5, %p932_p3 }
  0x1f   : > { %940 = shalt.err (!%p937_p7)
}
  0x20   : > { %s941_s5 = scalar_lea.vmem %s143_s23, 2048  ;;  %p949_p1 = scmp.lt.s32.totalorder %s143_s23, %s143_s23 }
  0x21   : > { %p942_p9 = scmp.ne.s32.totalorder %s143_s23, %s941_s5  ;;  %p950_p4 = scmp.lt.s32.totalorder %s941_s5, %s941_s5 }
  0x23   : > { %p944_p10 = pnand %p942_p9, %p930_p13  ;;  %p951_p8 = por %p950_p4, %p949_p1 }
  0x25   : > { %p945_p6 = pneg %p944_p10 }
  0x27   : > { %p952_p2 = pnand %p951_p8, %p945_p6 }
  0x29   : > { %955 = shalt.err (!%p952_p2)
}
  0x2a   : > { %s1075_s6 = smov 128   ;;  %s1076_s7 = smov 8  }
  0x2b   : > { %861 = dma.hbm_to_vmem [thread:$0]  (!%p1160_p11), %s1360_s1, 2048, %s143_s23, [#allocation7], %s1075_s6, %s1075_s6, %s1076_s7  }
  0x2c   : > { %p40_p1 = scmp.ge.s32.totalorder %s38_s25, 2  ;;  %s49_s16 = sadd.s32 1, %s1060_s11 }
  0x2d   : > { %p56_p2 = scmp.ne.s32.totalorder %s1060_s11, %s1056_s10  ;;  %p57_p4 = scmp.eq.s32.totalorder %s1072_s14, 0 }
  0x2e   : > { %s1387_s25 = smov (%p40_p1, %s38_s25), 0  ;;  %p1373_p8 = scmp.ne.s32.totalorder %s1367_s18, 0 }
  0x2f   : > { %p1190_p6 = por %p57_p4, %p56_p2  ;;  %s42_s26 = ssub.s32 %s1068_s13, %s1387_s25 }
  0x30   : > { %p1196_p10 = por %p1373_p8, %p56_p2  ;;  %p871_p12 = scmp.lt.s32.totalorder %s1072_s14, 2 }
  0x31   : > { %p47_p11 = scmp.eq.s32.totalorder %s42_s26, 0  ;;  %s156_s23 = sand.u32 1, %s1060_s11  }
  0x32   : > { %s728_s27 = sshll.u32 %s156_s23, 4  ;;  %s748_s29 = sshll.u32 %s1068_s13, 8 }
  0x33   : > { %s1205_s28 = scalar_select %p47_p11, %s1060_s11, %s49_s16  }
  0x34   : > { %s1211_s4 = scalar_lea.hbm %s1359_s0, %s748_s29  ;;  %s160_s18 = scalar_lea.vmem [#allocation3], %s728_s27 }
  0x35   : > { %s170_s5 = sshll.u32 %s160_s18, 4  ;;  %p1217_p13 = pnand %p871_p12, %p1190_p6  ;;  %s1213_s5 = int_to_ptr.vmem [resolvable:$true] %s170_s5 }
  0x36   : > { %s1221_s15 = scalar_lea.sflag [#allocation4], %s156_s23  ;;  %s956_s16 = scalar_lea.hbm %s1211_s4, 256 }
  0x37   : > { %p957_p0 = scmp.ne.s32.totalorder %s1211_s4, %s956_s16  ;;  %p958_p3 = pneg %p1217_p13 }
  0x38   : > { %s961_s22 = scalar_lea.hbm %s1359_s0, 512  ;;  %p962_p9 = scmp.lt.u32.totalorder %s1211_s4, %s1359_s0 }
  0x39   : > { %p959_p5 = pnand %p958_p3, %p957_p0  ;;  %p963_p1 = scmp.lt.u32.totalorder %s961_s22, %s956_s16 }
  0x3a   : > { %p965_p4 = scmp.lt.u32.totalorder %s956_s16, %s1211_s4 }
  0x3b   : > { %p960_p7 = pneg %p959_p5  ;;  %p964_p2 = por %p963_p1, %p962_p9 }
  0x3d   : > { %p966_p6 = por %p965_p4, %p964_p2 }
  0x3f   : > { %p967_p8 = pnand %p966_p6, %p960_p7 }
  0x41   : > { %970 = shalt.err (!%p967_p8)
}
  0x42   : > { %s971_s23 = scalar_lea.vmem %s1213_s5, 256  ;;  %s1077_s3 = smov [#allocation3]  }
  0x43   : > { %p972_p12 = scmp.ne.s32.totalorder %s1213_s5, %s971_s23  ;;  %s976_s18 = sshll.u32 %s1077_s3, 4  ;;  %s977_s18 = int_to_ptr.vmem [resolvable:$false] %s976_s18 }
  0x44   : > { %s978_s26 = scalar_lea.vmem %s977_s18, 512  ;;  %p979_p5 = scmp.lt.s32.totalorder %s1213_s5, %s977_s18 }
  0x45   : > { %p974_p11 = pnand %p972_p12, %p958_p3  ;;  %p980_p9 = scmp.lt.s32.totalorder %s978_s26, %s971_s23 }
  0x47   : > { %p975_p0 = pneg %p974_p11  ;;  %p981_p1 = por %p980_p9, %p979_p5 }
  0x49   : > { %p982_p2 = pnand %p981_p1, %p975_p0 }
  0x4b   : > { %985 = shalt.err (!%p982_p2)
}
  0x4c   : > { %865 = dma.hbm_to_vmem [thread:$0]  (!%p1217_p13), %s1211_s4, 256, %s1213_s5, %s1221_s15, %s1075_s6, %s1075_s6, %s1076_s7  }
  0x4d   : > { %p1376_p3 = scmp.ne.s32.totalorder %s1370_s21, 0 }
  0x4e   : > { %s1255_s16 = sand.u32 (!%p1376_p3), 1, %s1056_s10   ;;  %p1377_p7 = scmp.ne.s32.totalorder (!%p1376_p3), %s1368_s19, 0 }
  0x4f   : > { %182 = sbr.rel (%p1376_p3) target bundleno = 349 (0x15d), region = 28  ;;  %s732_s27 = sshll.u32 (!%p1376_p3), %s1255_s16, 4 }
  0x50   : > { %s185_s22 = scalar_lea.sflag (!%p1376_p3), [#allocation4], %s1255_s16  ;;  %s1259_s29 = scalar_lea.vmem (!%p1376_p3), [#allocation3], %s732_s27 }
  0x56   : > { %1039 = dma.done.wait (%p1377_p7), %s185_s22, 256  }
  0x57   : > { %1041 = vsyncadd (%p1377_p7), %s185_s22, 4294967040  ;;  %p1378_p13 = scmp.ne.s32.totalorder %s1366_s17, 0 }
  0x59   : > { %1043 = dma.done.wait (%p1378_p13), [#allocation7], 2048  }
  0x5a   : > { %1045 = vsyncadd (%p1378_p13), [#allocation7], 4294965248  ;;  %vm220_vm0 = vcmask 130048   ;;  %v1078_v0 = vmov 0.0   ;;  %v233_v1 = vld [vmem:[#allocation6] sm:$0xff]  ;;  %v234_v2 = vld [vmem:[#allocation6 + $0x8] sm:$0xff] }
  0x5b   : > { %222 = vst.msk [vmem:[#allocation2 + $0x8] sm:$0xff] %vm220_vm0, %v1078_v0  ;;  %221 = vst.msk [vmem:[#allocation2] sm:$0xff] %vm220_vm0, %v1078_v0  ;;  %v328_v3 = vld [vmem:[#allocation6 + $0x20] sm:$0xff]  ;;  %vm237_vm1 = vcmask 261120   ;;  %v818_v4 = vpack.c.bf16 %v234_v2, %v233_v1  ;;  %v329_v5 = vld [vmem:[#allocation6 + $0x28] sm:$0xff]  ;;  %s734_s17 = sshll.u32 %s1255_s16, 6 }
  0x5c   : > { %223 = vst.msk [vmem:[#allocation2 + $0x10] sm:$0xff] %vm220_vm0, %v1078_v0  ;;  %224 = vst.msk [vmem:[#allocation2 + $0x18] sm:$0xff] %vm220_vm0, %v1078_v0  ;;  %v235_v6 = vld [vmem:[#allocation6 + $0x10] sm:$0xff]  ;;  %v236_v7 = vld [vmem:[#allocation6 + $0x18] sm:$0xff]  ;;  %v826_v8 = vpack.c.bf16 %v329_v5, %v328_v3  ;;  %s212_s19 = scalar_lea.vmem [#allocation8], %s734_s17  ;;  %s749_s21 = sshll.u32 %s1064_s12, 10 }
  0x5d   : > { %225 = vst.msk [vmem:[#allocation2 + $0x20] sm:$0xff] %vm220_vm0, %v1078_v0  ;;  %226 = vst.msk [vmem:[#allocation2 + $0x28] sm:$0xff] %vm220_vm0, %v1078_v0  ;;  %v822_v9 = vpack.c.bf16 %v236_v7, %v235_v6  ;;  %v330_v10 = vld [vmem:[#allocation6 + $0x30] sm:$0xff]  ;;  %v331_v11 = vld [vmem:[#allocation6 + $0x38] sm:$0xff]  ;;  %819 = vmatprep.subr.bf16.mxu0 %v818_v4  ;;  %s620_s6 = sshll.u32 %s212_s19, 4  ;;  %s1304_s5 = scalar_lea.hbm %s1361_s2, %s749_s21  ;;  %s1306_s6 = int_to_ptr.vmem [resolvable:$true] %s620_s6 }
  0x5e   : > { %227 = vst.msk [vmem:[#allocation2 + $0x30] sm:$0xff] %vm220_vm0, %v1078_v0  ;;  %228 = vst.msk [vmem:[#allocation2 + $0x38] sm:$0xff] %vm220_vm0, %v1078_v0  ;;  %v229_v12 = vld [vmem:[%s1259_s29] sm:$0xff]  ;;  %v830_v13 = vpack.c.bf16 %v331_v11, %v330_v10  ;;  %v416_v15 = vld [vmem:[#allocation6 + $0x48] sm:$0xff]  ;;  %827 = vmatprep.subr.bf16.mxu1 %v826_v8  ;;  %821 = vmatpush3.bf16.msra.mxu0 %v818_v4  ;;  %s605_s12 = scalar_lea.sflag [#allocation5], %s1255_s16  ;;  %s986_s8 = scalar_lea.vmem %s1306_s6, 1024 }
  0x5f   : > { %782 = vmatprep.mubr.msk.f32.mxu0 %vm237_vm1, %v229_v12  ;;  %v415_v14 = vld [vmem:[#allocation6 + $0x40] sm:$0xff]  ;;  %v503_v17 = vld [vmem:[#allocation6 + $0x68] sm:$0xff]  ;;  %829 = vmatpush3.bf16.msra.mxu1 %v826_v8  ;;  %v417_v20 = vld [vmem:[#allocation6 + $0x50] sm:$0xff]  ;;  %p987_p4 = scmp.ne.s32.totalorder %s1306_s6, %s986_s8  ;;  %s1079_s15 = smov [#allocation8]  }
  0x60   : > { %v502_v16 = vld [vmem:[#allocation6 + $0x60] sm:$0xff]  ;;  %823 = vmatprep.subr.bf16.mxu0 %v822_v9  ;;  %v834_v18 = vpack.c.bf16 %v416_v15, %v415_v14  ;;  %831 = vmatprep.subr.bf16.mxu1 %v830_v13  ;;  %v418_v21 = vld [vmem:[#allocation6 + $0x58] sm:$0xff]  ;;  %v504_v22 = vld [vmem:[#allocation6 + $0x70] sm:$0xff]  ;;  %s990_s30 = sshll.u32 %s1079_s15, 4  ;;  %s991_s30 = int_to_ptr.vmem [resolvable:$false] %s990_s30 }
  0x61   : > { %793 = vmatprep.mubr.msk.f32.mxu1 %vm237_vm1, %v229_v12  ;;  %v842_v19 = vpack.c.bf16 %v503_v17, %v502_v16  ;;  %v505_v23 = vld [vmem:[#allocation6 + $0x78] sm:$0xff]  ;;  %v838_v25 = vpack.c.bf16 %v418_v21, %v417_v20  ;;  %p988_p6 = pnand %p987_p4, %p1196_p10  ;;  %s992_s23 = scalar_lea.vmem %s991_s30, 2048 }
  0x62   : > { %825 = vmatpush3.bf16.msra.mxu0 %v822_v9  ;;  %v230_v24 = vld [vmem:[%s1259_s29 + $0x8] sm:$0xff]  ;;  %v846_v26 = vpack.c.bf16 %v505_v23, %v504_v22  ;;  %v231_v29 = vld [vmem:[#allocation2] sm:$0xff]  ;;  %p993_p12 = scmp.lt.s32.totalorder %s1306_s6, %s991_s30  ;;  %p994_p11 = scmp.lt.s32.totalorder %s992_s23, %s986_s8 }
  0x63   : > { %833 = vmatpush3.bf16.msra.mxu1 %v830_v13  ;;  %835 = vmatprep.subr.bf16.mxu0 %v834_v18  ;;  %v232_v27 = vld [vmem:[#allocation2 + $0x8] sm:$0xff]  ;;  %v326_v28 = vld [vmem:[#allocation2 + $0x18] sm:$0xff]  ;;  %v325_v31 = vld [vmem:[#allocation2 + $0x10] sm:$0xff]  ;;  %p989_p8 = pneg %p988_p6 }
  0x64   : > { %843 = vmatprep.subr.bf16.mxu1 %v842_v19  ;;  %v413_v39 = vld [vmem:[#allocation2 + $0x28] sm:$0xff]  ;;  %v412_v41 = vld [vmem:[#allocation2 + $0x20] sm:$0xff]  ;;  %p995_p0 = por %p994_p11, %p993_p12 }
  0x65   : > { %783 = vmatmul.mubr.msk.f32.vlgmr.msra.gmra.mrb[0].mxu0 %vm237_vm1, %v230_v24  ;;  %v500_v40 = vld [vmem:[#allocation2 + $0x38] sm:$0xff]  ;;  %v499_v43 = vld [vmem:[#allocation2 + $0x30] sm:$0xff] }
  0x66   : > { %794 = vmatmul.mubr.msk.f32.vlgmr.msra.gmra.mrb[0].mxu1 %vm237_vm1, %v230_v24  ;;  %837 = vmatpush3.bf16.msra.mxu0 %v834_v18  ;;  %p996_p5 = pnand %p995_p0, %p989_p8 }
  0x67   : > { %845 = vmatpush3.bf16.msra.mxu1 %v842_v19  ;;  %839 = vmatprep.subr.bf16.mxu0 %v838_v25 }
  0x68   : > { %847 = vmatprep.subr.bf16.mxu1 %v846_v26  ;;  %804 = vmatprep.mubr.msk.f32.mxu0 %vm237_vm1, %v229_v12 }
  0x69   : > { %815 = vmatprep.mubr.msk.f32.mxu1 %vm237_vm1, %v229_v12 }
  0x6a   : > { %841 = vmatpush3.bf16.msra.mxu0 %v838_v25 }
  0x6b   : > { %849 = vmatpush3.bf16.msra.mxu1 %v846_v26 }
  0x6d   : > { %805 = vmatmul.mubr.msk.f32.vlgmr.msra.gmra.mrb[2].mxu0 %vm237_vm1, %v230_v24 }
  0x6e   : > { %816 = vmatmul.mubr.msk.f32.vlgmr.msra.gmra.mrb[2].mxu1 %vm237_vm1, %v230_v24 }
 0x138   : > { %v784_v30 = vpop.f32.mrb[0].mxu0 }
 0x139   : > { %v320_v32 = vadd.f32 %v784_v30, %v232_v27  ;;  %v795_v33 = vpop.f32.mrb[0].mxu1  ;;  %v310_v34 = vpop.f32.mrb[1].mxu0 }
 0x13a   : > { %v408_v35 = vadd.f32 %v795_v33, %v326_v28  ;;  %v319_v36 = vadd.f32 %v310_v34, %v231_v29  ;;  %v398_v37 = vpop.f32.mrb[1].mxu1 }
 0x13b   : > { %323 = vst.msk [vmem:[#allocation2 + $0x8] sm:$0xff] %vm220_vm0, %v320_v32  ;;  %v407_v38 = vadd.f32 %v398_v37, %v325_v31 }
 0x13c   : > { %410 = vst.msk [vmem:[#allocation2 + $0x18] sm:$0xff] %vm220_vm0, %v408_v35  ;;  %322 = vst.msk [vmem:[#allocation2] sm:$0xff] %vm220_vm0, %v319_v36 }
 0x13d   : > { %409 = vst.msk [vmem:[#allocation2 + $0x10] sm:$0xff] %vm220_vm0, %v407_v38 }
 0x140   : > { %v806_v42 = vpop.f32.mrb[2].mxu0 }
 0x141   : > { %v495_v44 = vadd.f32 %v806_v42, %v413_v39  ;;  %v817_v45 = vpop.f32.mrb[2].mxu1  ;;  %v485_v46 = vpop.f32.mrb[3].mxu0 }
 0x142   : > { %v589_v47 = vld [vmem:[#allocation2 + $0x8] sm:$0xff]  ;;  %v582_v48 = vadd.f32 %v817_v45, %v500_v40  ;;  %v494_v49 = vadd.f32 %v485_v46, %v412_v41  ;;  %v572_v50 = vpop.f32.mrb[3].mxu1 }
 0x143   : > { %597 = vst.msk [vmem:[%s212_s19 + $0x8] sm:$0xff] %vm220_vm0, %v589_v47  ;;  %v591_v51 = vld [vmem:[#allocation2 + $0x18] sm:$0xff]  ;;  %v588_v52 = vld [vmem:[#allocation2] sm:$0xff]  ;;  %497 = vst.msk [vmem:[#allocation2 + $0x28] sm:$0xff] %vm220_vm0, %v495_v44  ;;  %v581_v53 = vadd.f32 %v572_v50, %v499_v43 }
 0x144   : > { %599 = vst.msk [vmem:[%s212_s19 + $0x18] sm:$0xff] %vm220_vm0, %v591_v51  ;;  %596 = vst.msk [vmem:[%s212_s19] sm:$0xff] %vm220_vm0, %v588_v52  ;;  %v590_v54 = vld [vmem:[#allocation2 + $0x10] sm:$0xff] }
 0x145   : > { %584 = vst.msk [vmem:[#allocation2 + $0x38] sm:$0xff] %vm220_vm0, %v582_v48  ;;  %496 = vst.msk [vmem:[#allocation2 + $0x20] sm:$0xff] %vm220_vm0, %v494_v49 }
 0x146   : > { %598 = vst.msk [vmem:[%s212_s19 + $0x10] sm:$0xff] %vm220_vm0, %v590_v54  ;;  %583 = vst.msk [vmem:[#allocation2 + $0x30] sm:$0xff] %vm220_vm0, %v581_v53 }
 0x14a   : > { %v593_v55 = vld [vmem:[#allocation2 + $0x28] sm:$0xff] }
 0x14b   : > { %601 = vst.msk [vmem:[%s212_s19 + $0x28] sm:$0xff] %vm220_vm0, %v593_v55 }
 0x14c   : > { %v595_v56 = vld [vmem:[#allocation2 + $0x38] sm:$0xff]  ;;  %v592_v57 = vld [vmem:[#allocation2 + $0x20] sm:$0xff] }
 0x14d   : > { %603 = vst.msk [vmem:[%s212_s19 + $0x38] sm:$0xff] %vm220_vm0, %v595_v56  ;;  %600 = vst.msk [vmem:[%s212_s19 + $0x20] sm:$0xff] %vm220_vm0, %v592_v57  ;;  %v594_v58 = vld [vmem:[#allocation2 + $0x30] sm:$0xff] }
 0x14e   : > { %602 = vst.msk [vmem:[%s212_s19 + $0x30] sm:$0xff] %vm220_vm0, %v594_v58 }
 0x14f   : > { %999 = shalt.err (!%p996_p5)
}
 0x150   : > { %s1000_s3 = scalar_lea.hbm %s1304_s5, 1024  ;;  %s1004_s27 = scalar_lea.hbm %s1361_s2, 2048 }
 0x151   : > { %p1001_p9 = scmp.ne.s32.totalorder %s1304_s5, %s1000_s3  ;;  %p1005_p3 = scmp.lt.u32.totalorder %s1304_s5, %s1361_s2 }
 0x152   : > { %p1006_p7 = scmp.lt.u32.totalorder %s1004_s27, %s1000_s3  ;;  %p1008_p4 = scmp.lt.u32.totalorder %s1000_s3, %s1304_s5 }
 0x153   : > { %p1002_p1 = pnand %p1001_p9, %p1196_p10 }
 0x154   : > { %p1007_p13 = por %p1006_p7, %p1005_p3 }
 0x155   : > { %p1003_p2 = pneg %p1002_p1 }
 0x156   : > { %p1009_p6 = por %p1008_p4, %p1007_p13 }
 0x158   : > { %p1010_p8 = pnand %p1009_p6, %p1003_p2 }
 0x15a   : > { %1013 = shalt.err (!%p1010_p8)
}
 0x15b   : > { %s1080_s17 = smov 128   ;;  %s1081_s19 = smov 8  }
 0x15c   : > { %856 = dma.vmem_to_hbm [thread:$0]  (%p1196_p10), %s1306_s6, 1024, %s1304_s5, %s605_s12, %s1080_s17, %s1080_s17, %s1081_s19  }
 0x15d PF: > { %s635_s21 = sand.u32 1, %s1052_s9   ;;  %p1379_p12 = scmp.ne.s32.totalorder %s1369_s20, 0 }
 0x15e   : > { %p1380_p11 = scmp.ge.s32.totalorder %s1072_s14, 2  ;;  %s636_s7 = scalar_lea.sflag [#allocation5], %s635_s21 }
 0x160   : > { %p867_p0 = pnand %p1380_p11, %p1379_p12 }
 0x162   : > { %1047 = dma.done.wait (!%p867_p0), %s636_s7, 1024  }
 0x163   : > { %1049 = vsyncadd (!%p867_p0), %s636_s7, 4294966272  ;;  %s19_s14 = sadd.s32 1, %s1072_s14   ;;  %s1381_s9 = smov %s1056_s10 }
 0x164   : > { %p16_p5 = scmp.ge.s32.totalorder %s19_s14, 4   ;;  %s1382_s10 = smov %s1060_s11 }
 0x165   : > { %s1383_s11 = smov %s1205_s28  ;;  %s1384_s12 = smov %s1068_s13 }
 0x166   : > { %s1385_s13 = smov %s1387_s25  ;;  %18 = sbr.rel (!%p16_p5) target bundleno = 7 (0x7), region = 92 }
 0x16d   :  { %641 = vsyncpa [#allocation4], 1 }
 0x16e   :  { %643 = vsyncpa [#allocation4 + $0x1], 1 }
 0x16f   :  { %644 = vsyncpa [#allocation7], 1 }
 0x170   :  { %645 = vsyncpa [#allocation5], 1 }
 0x171   :  { %647 = vsyncpa [#allocation5 + $0x1], 1 }

</bundles_post_ra>
